<compile_context>
chip_gen: v5e
topology: v5e:2x2
jax: 0.10.0
libtpu: 0.0.40
codegen_flags: <defaults>
</compile_context>

<pallas_src>
import functools

import jax
import jax.numpy as jnp
from jax.experimental import pallas as pl
from jax.experimental.pallas import tpu as pltpu

_LANES = 128
_CHUNK_ROWS = 256       # rows processed per inner loop step (keeps temporaries small)
_MAX_TILE_ROWS = 8192   # cap: 8192 x 128 elements (~4 MiB f32) per input block


def _vmem_capacity_bytes():
    try:
        info = pltpu.get_tpu_info()
        cap = getattr(info, "vmem_capacity_bytes", None)
        if cap:
            return int(cap)
    except Exception:
        pass
    return 64 * 1024 * 1024  # conservative (v7x per-core VMEM)


def _pick_tile_rows(rows_total, bytes_per_row):
    """Choose (tile_rows, chunk_rows) for the row-tiled streaming reduction."""
    if rows_total <= _CHUNK_ROWS:
        return rows_total, rows_total
    budget = int(0.4 * _vmem_capacity_bytes())      # double-buffered input blocks
    rows = budget // max(bytes_per_row, 1)
    rows = min(rows, _MAX_TILE_ROWS, rows_total)
    rows = max(_CHUNK_ROWS, (rows // _CHUNK_ROWS) * _CHUNK_ROWS)
    return rows, _CHUNK_ROWS


def _dice_partial_kernel(pred_ref, target_ref, out_ref, *,
                         rows_total, tile_rows, chunk_rows):
    """Accumulate per-batch lane partials of sum(p*t), sum(p*p), sum(t*t).

    pred_ref/target_ref: (tile_rows, 128) blocks in their native dtype.
    out_ref: (3, 128) float32, resident across the row-tile ("arbitrary") axis.
    """
    k = pl.program_id(1)

    @pl.when(k == 0)
    def _():
        out_ref[...] = jnp.zeros_like(out_ref)

    num_chunks = tile_rows // chunk_rows            # static
    needs_mask = (rows_total % tile_rows) != 0      # static

    def body(c, carry):
        acc_pt, acc_pp, acc_tt = carry
        r = pl.multiple_of(c * chunk_rows, chunk_rows)
        p = pred_ref[pl.ds(r, chunk_rows), :].astype(jnp.float32)
        t = target_ref[pl.ds(r, chunk_rows), :].astype(jnp.float32)
        if needs_mask:
            # Tail tile: rows past rows_total hold unspecified data -> zero them.
            rows_left = rows_total - k * tile_rows - c * chunk_rows
            rid = jax.lax.broadcasted_iota(jnp.int32, p.shape, 0)
            ok = rid < rows_left
            p = jnp.where(ok, p, 0.0)
            t = jnp.where(ok, t, 0.0)
        acc_pt = acc_pt + jnp.sum(p * t, axis=0, keepdims=True)
        acc_pp = acc_pp + jnp.sum(p * p, axis=0, keepdims=True)
        acc_tt = acc_tt + jnp.sum(t * t, axis=0, keepdims=True)
        return acc_pt, acc_pp, acc_tt

    z = jnp.zeros((1, _LANES), jnp.float32)
    acc_pt, acc_pp, acc_tt = jax.lax.fori_loop(0, num_chunks, body, (z, z, z))

    out_ref[pl.ds(0, 1), :] += acc_pt
    out_ref[pl.ds(1, 1), :] += acc_pp
    out_ref[pl.ds(2, 1), :] += acc_tt


@jax.jit
def dice_loss(pred, target):
    """pred: (N, 1, D, H, W); target: (N, D, H, W). Returns scalar float32."""
    pred = jnp.squeeze(pred, axis=1)                 # (N, D, H, W)
    N = pred.shape[0]
    L = 1
    for d in pred.shape[1:]:
        L *= int(d)

    p2 = pred.reshape(N, L)                          # free reshape, native dtype
    t2 = target.reshape(N, L)

    # Lane-pack the flattened spatial axis as rows of 128. Only pad in the
    # rare L % 128 != 0 case (zero padding is sum-neutral).
    if L % _LANES != 0:
        Lp = pl.cdiv(L, _LANES) * _LANES
        p2 = jnp.pad(p2, ((0, 0), (0, Lp - L)))
        t2 = jnp.pad(t2, ((0, 0), (0, Lp - L)))
        L = Lp
    R = L // _LANES
    p3 = p2.reshape(N, R, _LANES)
    t3 = t2.reshape(N, R, _LANES)

    bytes_per_row = 2 * _LANES * (p3.dtype.itemsize + t3.dtype.itemsize)
    tile_rows, chunk_rows = _pick_tile_rows(R, bytes_per_row)
    num_tiles = pl.cdiv(R, tile_rows)

    buf_bytes = 2 * tile_rows * _LANES * (p3.dtype.itemsize + t3.dtype.itemsize)
    cap = _vmem_capacity_bytes()
    vmem_limit = min(int(0.9 * cap), max(48 << 20, buf_bytes + (16 << 20)))

    kernel = functools.partial(
        _dice_partial_kernel,
        rows_total=R, tile_rows=tile_rows, chunk_rows=chunk_rows)

    partials = pl.pallas_call(
        kernel,
        out_shape=jax.ShapeDtypeStruct((N, 3, _LANES), jnp.float32),
        grid_spec=pltpu.PrefetchScalarGridSpec(
            num_scalar_prefetch=0,
            grid=(N, num_tiles),
            in_specs=[
                pl.BlockSpec((None, tile_rows, _LANES), lambda b, k: (b, k, 0)),
                pl.BlockSpec((None, tile_rows, _LANES), lambda b, k: (b, k, 0)),
            ],
            out_specs=pl.BlockSpec((None, 3, _LANES), lambda b, k: (b, 0, 0)),
        ),
        compiler_params=pltpu.CompilerParams(
            dimension_semantics=("parallel", "arbitrary"),
            vmem_limit_bytes=vmem_limit),
    )(p3, t3)

    # Tiny epilogue in plain JAX: final cross-lane reduce + dice/mean/clamp.
    sums = jnp.sum(partials, axis=-1)                # (N, 3)
    inter, pp, tt = sums[:, 0], sums[:, 1], sums[:, 2]
    smooth = jnp.float32(1.0)
    dice = 2.0 * inter / (pp + tt + smooth)
    return jnp.clip(jnp.mean(1.0 - dice), 0.0, 1.0)


def _reference_dice_loss(pred, target):
    """Pure-JAX reference matching the PyTorch module."""
    p = jnp.squeeze(pred, axis=1).astype(jnp.float32)
    t = target.astype(jnp.float32)
    smooth = 1.0
    inter = jnp.sum(p * t, axis=(1, 2, 3))
    denom = jnp.sum(p * p, axis=(1, 2, 3)) + jnp.sum(t * t, axis=(1, 2, 3)) + smooth
    dice = 2.0 * inter / denom
    return jnp.clip(jnp.mean(1.0 - dice), 0.0, 1.0)


if __name__ == "__main__":
    key = jax.random.PRNGKey(0)
    k1, k2 = jax.random.split(key)

    # Small 3-D volume: batch=2, channel=1, D=H=W=16 (squeeze(dim=1) + three
    # spatial sums imply a 5-D pred / 4-D target).
    N, D, H, W = 2, 16, 16, 16
    pred = jax.nn.sigmoid(jax.random.normal(k1, (N, 1, D, H, W), jnp.float32))
    target = (jax.random.uniform(k2, (N, D, H, W), jnp.float32) > 0.5).astype(jnp.float32)

    loss = jax.block_until_ready(dice_loss(pred, target))
    ref = jax.block_until_ready(_reference_dice_loss(pred, target))

    assert jnp.allclose(loss, ref, rtol=1e-5, atol=1e-6), (loss, ref)
    print("KERNEL_OK")
</pallas_src>

<mosaic_0001>
module attributes {stable_mosaic.version = 11 : i64} {
  func.func @_dice_partial_kernel(%arg0: i32, %arg1: i32, %arg2: memref<1x32x128xf32, #tpu.memory_space<vmem>>, %arg3: memref<1x32x128xf32, #tpu.memory_space<vmem>>, %arg4: memref<1x3x128xf32, #tpu.memory_space<vmem>>) attributes {dimension_semantics = [#tpu.dimension_semantics<parallel>, #tpu.dimension_semantics<arbitrary>], iteration_bounds = array<i64: 2, 1>, scalar_prefetch = 0 : i64, scratch_operands = 0 : i64, tpu.core_type = #tpu.core_type<tc>, window_params = [{transform_indices = @transform_0, window_bounds = array<i64: 1, 32, 128>}, {transform_indices = @transform_1, window_bounds = array<i64: 1, 32, 128>}, {transform_indices = @transform_2, window_bounds = array<i64: 1, 3, 128>}]} {
    %c0_i32 = arith.constant 0 : i32
    %0 = arith.cmpi eq, %arg1, %c0_i32 : i32
    %1 = arith.extui %0 : i1 to i32
    %c0_i32_0 = arith.constant 0 : i32
    %2 = arith.cmpi ne, %1, %c0_i32_0 : i32
    scf.if %2 {
      %cst_24 = arith.constant 0.000000e+00 : f32
      %42 = vector.broadcast %cst_24 : f32 to vector<3x128xf32>
      %c0_25 = arith.constant 0 : index
      %c0_26 = arith.constant 0 : index
      %c0_27 = arith.constant 0 : index
      %43 = vector.load %arg4[%c0_25, %c0_26, %c0_27] : memref<1x3x128xf32, #tpu.memory_space<vmem>>, vector<1x3x128xf32>
      %44 = vector.shape_cast %43 : vector<1x3x128xf32> to vector<3x128xf32>
      %45 = vector.shape_cast %42 : vector<3x128xf32> to vector<1x3x128xf32>
      tpu.vector_store %arg4[%c0_25, %c0_26, %c0_27], %45 {strides = array<i32>} : memref<1x3x128xf32, #tpu.memory_space<vmem>>, vector<1x3x128xf32>,
    } else {
    }
    %cst = arith.constant 0.000000e+00 : f32
    %3 = vector.broadcast %cst : f32 to vector<1x128xf32>
    %c0_i32_1 = arith.constant 0 : i32
    %c32_i32 = arith.constant 32 : i32
    %4 = arith.muli %c0_i32_1, %c32_i32 : i32
    %5 = tpu.assume_multiple %4, 32 : i32
    %c0 = arith.constant 0 : index
    %6 = arith.index_cast %5 : i32 to index
    %c0_2 = arith.constant 0 : index
    %7 = vector.load %arg2[%c0, %6, %c0_2] : memref<1x32x128xf32, #tpu.memory_space<vmem>>, vector<1x32x128xf32>
    %8 = vector.shape_cast %7 : vector<1x32x128xf32> to vector<32x128xf32>
    %c0_3 = arith.constant 0 : index
    %9 = arith.index_cast %5 : i32 to index
    %c0_4 = arith.constant 0 : index
    %10 = vector.load %arg3[%c0_3, %9, %c0_4] : memref<1x32x128xf32, #tpu.memory_space<vmem>>, vector<1x32x128xf32>
    %11 = vector.shape_cast %10 : vector<1x32x128xf32> to vector<32x128xf32>
    %12 = arith.mulf %8, %11 : vector<32x128xf32>
    %cst_5 = arith.constant dense<0.000000e+00> : vector<128xf32>
    %13 = vector.multi_reduction <add>, %12, %cst_5 [0] : vector<32x128xf32> to vector<128xf32>
    %14 = vector.shape_cast %13 : vector<128xf32> to vector<1x128xf32>
    %15 = arith.addf %3, %14 : vector<1x128xf32>
    %16 = arith.mulf %8, %8 : vector<32x128xf32>
    %cst_6 = arith.constant dense<0.000000e+00> : vector<128xf32>
    %17 = vector.multi_reduction <add>, %16, %cst_6 [0] : vector<32x128xf32> to vector<128xf32>
    %18 = vector.shape_cast %17 : vector<128xf32> to vector<1x128xf32>
    %19 = arith.addf %3, %18 : vector<1x128xf32>
    %20 = arith.mulf %11, %11 : vector<32x128xf32>
    %cst_7 = arith.constant dense<0.000000e+00> : vector<128xf32>
    %21 = vector.multi_reduction <add>, %20, %cst_7 [0] : vector<32x128xf32> to vector<128xf32>
    %22 = vector.shape_cast %21 : vector<128xf32> to vector<1x128xf32>
    %23 = arith.addf %3, %22 : vector<1x128xf32>
    %c1_i32 = arith.constant 1 : i32
    %c0_8 = arith.constant 0 : index
    %c0_9 = arith.constant 0 : index
    %c0_10 = arith.constant 0 : index
    %24 = vector.load %arg4[%c0_8, %c0_9, %c0_10] : memref<1x3x128xf32, #tpu.memory_space<vmem>>, vector<1x1x128xf32>
    %25 = vector.shape_cast %24 : vector<1x1x128xf32> to vector<1x128xf32>
    %26 = arith.addf %25, %15 : vector<1x128xf32>
    %c0_11 = arith.constant 0 : index
    %c0_12 = arith.constant 0 : index
    %c0_13 = arith.constant 0 : index
    %27 = vector.load %arg4[%c0_11, %c0_12, %c0_13] : memref<1x3x128xf32, #tpu.memory_space<vmem>>, vector<1x1x128xf32>
    %28 = vector.shape_cast %27 : vector<1x1x128xf32> to vector<1x128xf32>
    %29 = vector.shape_cast %26 : vector<1x128xf32> to vector<1x1x128xf32>
    tpu.vector_store %arg4[%c0_11, %c0_12, %c0_13], %29 {strides = array<i32>} : memref<1x3x128xf32, #tpu.memory_space<vmem>>, vector<1x1x128xf32>,
    %c0_14 = arith.constant 0 : index
    %c1 = arith.constant 1 : index
    %c0_15 = arith.constant 0 : index
    %30 = vector.load %arg4[%c0_14, %c1, %c0_15] : memref<1x3x128xf32, #tpu.memory_space<vmem>>, vector<1x1x128xf32>
    %31 = vector.shape_cast %30 : vector<1x1x128xf32> to vector<1x128xf32>
    %32 = arith.addf %31, %19 : vector<1x128xf32>
    %c0_16 = arith.constant 0 : index
    %c1_17 = arith.constant 1 : index
    %c0_18 = arith.constant 0 : index
    %33 = vector.load %arg4[%c0_16, %c1_17, %c0_18] : memref<1x3x128xf32, #tpu.memory_space<vmem>>, vector<1x1x128xf32>
    %34 = vector.shape_cast %33 : vector<1x1x128xf32> to vector<1x128xf32>
    %35 = vector.shape_cast %32 : vector<1x128xf32> to vector<1x1x128xf32>
    tpu.vector_store %arg4[%c0_16, %c1_17, %c0_18], %35 {strides = array<i32>} : memref<1x3x128xf32, #tpu.memory_space<vmem>>, vector<1x1x128xf32>,
    %c0_19 = arith.constant 0 : index
    %c2 = arith.constant 2 : index
    %c0_20 = arith.constant 0 : index
    %36 = vector.load %arg4[%c0_19, %c2, %c0_20] : memref<1x3x128xf32, #tpu.memory_space<vmem>>, vector<1x1x128xf32>
    %37 = vector.shape_cast %36 : vector<1x1x128xf32> to vector<1x128xf32>
    %38 = arith.addf %37, %23 : vector<1x128xf32>
    %c0_21 = arith.constant 0 : index
    %c2_22 = arith.constant 2 : index
    %c0_23 = arith.constant 0 : index
    %39 = vector.load %arg4[%c0_21, %c2_22, %c0_23] : memref<1x3x128xf32, #tpu.memory_space<vmem>>, vector<1x1x128xf32>
    %40 = vector.shape_cast %39 : vector<1x1x128xf32> to vector<1x128xf32>
    %41 = vector.shape_cast %38 : vector<1x128xf32> to vector<1x1x128xf32>
    tpu.vector_store %arg4[%c0_21, %c2_22, %c0_23], %41 {strides = array<i32>} : memref<1x3x128xf32, #tpu.memory_space<vmem>>, vector<1x1x128xf32>,
    return
  }
  func.func @transform_0(%arg0: i32, %arg1: i32) -> (i32, i32, i32) {
    %c0_i32 = arith.constant 0 : i32
    %c0_i32_0 = arith.constant 0 : i32
    return %arg0, %arg1, %c0_i32 : i32, i32, i32
  }
  func.func @transform_1(%arg0: i32, %arg1: i32) -> (i32, i32, i32) {
    %c0_i32 = arith.constant 0 : i32
    %c0_i32_0 = arith.constant 0 : i32
    return %arg0, %arg1, %c0_i32 : i32, i32, i32
  }
  func.func @transform_2(%arg0: i32, %arg1: i32) -> (i32, i32, i32) {
    %c0_i32 = arith.constant 0 : i32
    %c0_i32_0 = arith.constant 0 : i32
    %c0_i32_1 = arith.constant 0 : i32
    return %arg0, %c0_i32, %c0_i32_0 : i32, i32, i32
  }
}

</mosaic_0001>

<bundles_post_ra>
// kernel: squeeze.4
= control target key start
LH: loop header
LB: loop body
LE: loop exit
PB: predicated region body
PF: predicated region fallthrough
CT: control target
= control target key end

     0   :  { %2 = vsyncpa [#allocation1], 0  ;;  %s783_s8 = smov [#allocation0]   ;;  %s1164_s0 = inlined_call_operand.hbm [shape: f32[2,1,16,16,16], index: 0, kind: input, shape index: {}]   ;;  %s1165_s1 = inlined_call_operand.vmem [shape: f32[2,32,128], index: 1, kind: output, shape index: {}]  }
   0x1   :  { %s6_s0 = sshll.u32 %s1164_s0, 4  ;;  %s8_s9 = sshll.u32 %s783_s8, 4  ;;  %s7_s0 = int_to_ptr.hbm [resolvable:$true] %s6_s0  ;;  %s9_s9 = int_to_ptr.vmem [resolvable:$true] %s8_s9 }
   0x2   :  { %11 = dma.hbm_to_vmem [thread:$0]  %s7_s0, 8192, %s9_s9, [#allocation1]  }
   0x3   :  { %781 = dma.done.wait [#allocation1], 8192  }
   0x4   :  { %782 = vsyncadd [#allocation1], 4294959104  ;;  %vm16_vm0 = vcmask 1047556   ;;  %v105_v0 = vld [vmem:[#allocation0 + $0x47] ss:$8 sm:$0xf]  }
   0x5   :  { %v107_v1 = vld [vmem:[#allocation0 + $0x47] ss:$8 sm:$0xf0]   ;;  %s784_s10 = smov 112   ;;  %s785_s11 = smov 96   ;;  %vm18_vm1 = vcmask 130048  }
   0x6   :  { %v109_v2 = vsel %vm16_vm0, %v107_v1, %v105_v0  ;;  %v84_v3 = vld [vmem:[#allocation0 + $0x7] ss:$8 sm:$0xf]   ;;  %v192_v24 = vld [vmem:[#allocation0 + $0x46] ss:$8 sm:$0xf]  }
   0x7   :  { %v86_v4 = vld [vmem:[#allocation0 + $0x7] ss:$8 sm:$0xf0]   ;;  %110 = vrot.lane.b32.xlu1 %v109_v2, %s784_s10  ;;  %v194_v25 = vld [vmem:[#allocation0 + $0x46] ss:$8 sm:$0xf0]  }
   0x8   :  { %v88_v5 = vsel %vm16_vm0, %v86_v4, %v84_v3  ;;  %v116_v6 = vld [vmem:[#allocation0 + $0x147] ss:$8 sm:$0xf]   ;;  %v171_v26 = vld [vmem:[#allocation0 + $0x6] ss:$8 sm:$0xf]   ;;  %v196_v30 = vsel %vm16_vm0, %v194_v25, %v192_v24 }
   0x9   :  { %89 = vrot.lane.b32.xlu0 %v88_v5, %s784_s10  ;;  %v118_v7 = vld [vmem:[#allocation0 + $0x147] ss:$8 sm:$0xf0]   ;;  %v173_v27 = vld [vmem:[#allocation0 + $0x6] ss:$8 sm:$0xf0]  }
   0xa   :  { %v94_v8 = vld [vmem:[#allocation0 + $0x107] ss:$8 sm:$0xf]   ;;  %v120_v10 = vsel %vm16_vm0, %v118_v7, %v116_v6  ;;  %v181_v28 = vld [vmem:[#allocation0 + $0x106] ss:$8 sm:$0xf]   ;;  %v175_v31 = vsel %vm16_vm0, %v173_v27, %v171_v26 }
   0xb   :  { %v96_v9 = vld [vmem:[#allocation0 + $0x107] ss:$8 sm:$0xf0]   ;;  %v183_v29 = vld [vmem:[#allocation0 + $0x106] ss:$8 sm:$0xf0]  }
   0xc   :  { %v98_v11 = vsel %vm16_vm0, %v96_v9, %v94_v8  ;;  %v127_v12 = vld [vmem:[#allocation0 + $0x87] ss:$8 sm:$0xf]   ;;  %v185_v32 = vsel %vm16_vm0, %v183_v29, %v181_v28  ;;  %v225_v33 = vld [vmem:[#allocation0 + $0x186] ss:$8 sm:$0xf]  }
   0xd   :  { %v129_v13 = vld [vmem:[#allocation0 + $0x87] ss:$8 sm:$0xf0]   ;;  %v227_v34 = vld [vmem:[#allocation0 + $0x186] ss:$8 sm:$0xf0]  }
   0xe   :  { %v131_v14 = vsel %vm16_vm0, %v129_v13, %v127_v12  ;;  %v160_v15 = vld [vmem:[#allocation0 + $0x1c7] ss:$8 sm:$0xf]   ;;  %v203_v35 = vld [vmem:[#allocation0 + $0x146] ss:$8 sm:$0xf]   ;;  %v229_v39 = vsel %vm16_vm0, %v227_v34, %v225_v33 }
   0xf   :  { %121 = vrot.lane.b32.xlu1 %v120_v10, %s784_s10  ;;  %132 = vrot.lane.b32.xlu2 %v131_v14, %s784_s10  ;;  %v162_v16 = vld [vmem:[#allocation0 + $0x1c7] ss:$8 sm:$0xf0]   ;;  %v205_v36 = vld [vmem:[#allocation0 + $0x146] ss:$8 sm:$0xf0]  }
  0x10   :  { %v138_v17 = vld [vmem:[#allocation0 + $0x187] ss:$8 sm:$0xf]   ;;  %v164_v21 = vsel %vm16_vm0, %v162_v16, %v160_v15  ;;  %v214_v37 = vld [vmem:[#allocation0 + $0x86] ss:$8 sm:$0xf]   ;;  %v207_v40 = vsel %vm16_vm0, %v205_v36, %v203_v35 }
  0x11   :  { %99 = vrot.lane.b32.xlu0 %v98_v11, %s784_s10  ;;  %v140_v18 = vld [vmem:[#allocation0 + $0x187] ss:$8 sm:$0xf0]   ;;  %v216_v38 = vld [vmem:[#allocation0 + $0x86] ss:$8 sm:$0xf0]  }
  0x12   :  { %v149_v19 = vld [vmem:[#allocation0 + $0xc7] ss:$8 sm:$0xf]   ;;  %v142_v22 = vsel %vm16_vm0, %v140_v18, %v138_v17  ;;  %v218_v41 = vsel %vm16_vm0, %v216_v38, %v214_v37  ;;  %v258_v42 = vld [vmem:[#allocation0 + $0x5] ss:$8 sm:$0xf]  }
  0x13   :  { %v151_v20 = vld [vmem:[#allocation0 + $0xc7] ss:$8 sm:$0xf0]   ;;  %v260_v43 = vld [vmem:[#allocation0 + $0x5] ss:$8 sm:$0xf0]  }
  0x14   :  { %v153_v23 = vsel %vm16_vm0, %v151_v20, %v149_v19  ;;  %v236_v44 = vld [vmem:[#allocation0 + $0xc6] ss:$8 sm:$0xf]   ;;  %v262_v48 = vsel %vm16_vm0, %v260_v43, %v258_v42  ;;  %s786_s12 = smov 80   ;;  %s787_s13 = smov 64   ;;  %vm91_vm2 = vcmask 1048448  }
  0x15   :  { %v238_v45 = vld [vmem:[#allocation0 + $0xc6] ss:$8 sm:$0xf0]   ;;  %v290_v51 = vld [vmem:[#allocation0 + $0x145] ss:$8 sm:$0xf]  }
  0x16   :  { %v247_v46 = vld [vmem:[#allocation0 + $0x1c6] ss:$8 sm:$0xf]   ;;  %v240_v49 = vsel %vm16_vm0, %v238_v45, %v236_v44  ;;  %v292_v52 = vld [vmem:[#allocation0 + $0x145] ss:$8 sm:$0xf0]  }
  0x17   :  { %165 = vrot.lane.b32.xlu1 %v164_v21, %s784_s10  ;;  %143 = vrot.lane.b32.xlu2 %v142_v22, %s784_s10  ;;  %v249_v47 = vld [vmem:[#allocation0 + $0x1c6] ss:$8 sm:$0xf0]   ;;  %v268_v53 = vld [vmem:[#allocation0 + $0x105] ss:$8 sm:$0xf]   ;;  %v294_v57 = vsel %vm16_vm0, %v292_v52, %v290_v51 }
  0x18   :  { %v251_v50 = vsel %vm16_vm0, %v249_v47, %v247_v46  ;;  %v270_v54 = vld [vmem:[#allocation0 + $0x105] ss:$8 sm:$0xf0]   ;;  %v355_v5 = vld [vmem:[#allocation0 + $0x104] ss:$8 sm:$0xf]  }
  0x19   :  { %154 = vrot.lane.b32.xlu0 %v153_v23, %s784_s10  ;;  %v279_v55 = vld [vmem:[#allocation0 + $0x45] ss:$8 sm:$0xf]   ;;  %v272_v58 = vsel %vm16_vm0, %v270_v54, %v268_v53  ;;  %v357_v6 = vld [vmem:[#allocation0 + $0x104] ss:$8 sm:$0xf0]  }
  0x1a   :  { %v281_v56 = vld [vmem:[#allocation0 + $0x45] ss:$8 sm:$0xf0]   ;;  %v345_v9 = vld [vmem:[#allocation0 + $0x4] ss:$8 sm:$0xf]   ;;  %v359_v11 = vsel %vm16_vm0, %v357_v6, %v355_v5 }
  0x1b   :  { %v283_v59 = vsel %vm16_vm0, %v281_v56, %v279_v55  ;;  %v323_v60 = vld [vmem:[#allocation0 + $0xc5] ss:$8 sm:$0xf]   ;;  %v347_v10 = vld [vmem:[#allocation0 + $0x4] ss:$8 sm:$0xf0]  }
  0x1c   :  { %v325_v61 = vld [vmem:[#allocation0 + $0xc5] ss:$8 sm:$0xf0]   ;;  %v349_v13 = vsel %vm16_vm0, %v347_v10, %v345_v9  ;;  %v388_v14 = vld [vmem:[#allocation0 + $0x84] ss:$8 sm:$0xf]  }
  0x1d   :  { %v301_v62 = vld [vmem:[#allocation0 + $0x85] ss:$8 sm:$0xf]   ;;  %v327_v2 = vsel %vm16_vm0, %v325_v61, %v323_v60  ;;  %v390_v15 = vld [vmem:[#allocation0 + $0x84] ss:$8 sm:$0xf0]  }
  0x1e   :  { %v303_v63 = vld [vmem:[#allocation0 + $0x85] ss:$8 sm:$0xf0]   ;;  %v366_v16 = vld [vmem:[#allocation0 + $0x44] ss:$8 sm:$0xf]   ;;  %v392_v20 = vsel %vm16_vm0, %v390_v15, %v388_v14 }
  0x1f   :  { %197 = vrot.lane.b32.xlu1 %v196_v30, %s785_s11  ;;  %176 = vrot.lane.b32.xlu2 %v175_v31, %s785_s11  ;;  %v312_v0 = vld [vmem:[#allocation0 + $0x185] ss:$8 sm:$0xf]   ;;  %v305_v3 = vsel %vm16_vm0, %v303_v63, %v301_v62  ;;  %v368_v17 = vld [vmem:[#allocation0 + $0x44] ss:$8 sm:$0xf0]  }
  0x20   :  { %v314_v1 = vld [vmem:[#allocation0 + $0x185] ss:$8 sm:$0xf0]   ;;  %v377_v18 = vld [vmem:[#allocation0 + $0x144] ss:$8 sm:$0xf]   ;;  %v370_v21 = vsel %vm16_vm0, %v368_v17, %v366_v16 }
  0x21   :  { %186 = vrot.lane.b32.xlu0 %v185_v32, %s785_s11  ;;  %v316_v4 = vsel %vm16_vm0, %v314_v1, %v312_v0  ;;  %v334_v7 = vld [vmem:[#allocation0 + $0x1c5] ss:$8 sm:$0xf]   ;;  %v379_v19 = vld [vmem:[#allocation0 + $0x144] ss:$8 sm:$0xf0]  }
  0x22   :  { %v336_v8 = vld [vmem:[#allocation0 + $0x1c5] ss:$8 sm:$0xf0]   ;;  %v381_v22 = vsel %vm16_vm0, %v379_v19, %v377_v18  ;;  %v421_v23 = vld [vmem:[#allocation0 + $0x1c4] ss:$8 sm:$0xf]  }
  0x23   :  { %v338_v12 = vsel %vm16_vm0, %v336_v8, %v334_v7  ;;  %v423_v24 = vld [vmem:[#allocation0 + $0x1c4] ss:$8 sm:$0xf0]   ;;  %v453_v32 = vld [vmem:[#allocation0 + $0x43] ss:$8 sm:$0xf]  }
  0x24   :  { %v399_v25 = vld [vmem:[#allocation0 + $0x184] ss:$8 sm:$0xf]   ;;  %v425_v29 = vsel %vm16_vm0, %v423_v24, %v421_v23  ;;  %v455_v33 = vld [vmem:[#allocation0 + $0x43] ss:$8 sm:$0xf0]  }
  0x25   :  { %v401_v26 = vld [vmem:[#allocation0 + $0x184] ss:$8 sm:$0xf0]   ;;  %v432_v34 = vld [vmem:[#allocation0 + $0x3] ss:$8 sm:$0xf]   ;;  %v457_v44 = vsel %vm16_vm0, %v455_v33, %v453_v32 }
  0x26   :  { %v410_v27 = vld [vmem:[#allocation0 + $0xc4] ss:$8 sm:$0xf]   ;;  %v403_v30 = vsel %vm16_vm0, %v401_v26, %v399_v25  ;;  %v434_v35 = vld [vmem:[#allocation0 + $0x3] ss:$8 sm:$0xf0]  }
  0x27   :  { %230 = vrot.lane.b32.xlu1 %v229_v39, %s785_s11  ;;  %208 = vrot.lane.b32.xlu2 %v207_v40, %s785_s11  ;;  %v412_v28 = vld [vmem:[#allocation0 + $0xc4] ss:$8 sm:$0xf0]   ;;  %v442_v36 = vld [vmem:[#allocation0 + $0x103] ss:$8 sm:$0xf]   ;;  %v436_v45 = vsel %vm16_vm0, %v434_v35, %v432_v34 }
  0x28   :  { %v414_v31 = vsel %vm16_vm0, %v412_v28, %v410_v27  ;;  %v21_v37 = vld [vmem:[#allocation0 + $0x40] ss:$8 sm:$0xf]   ;;  %v444_v40 = vld [vmem:[#allocation0 + $0x103] ss:$8 sm:$0xf0]  }
  0x29   :  { %219 = vrot.lane.b32.xlu0 %v218_v41, %s785_s11  ;;  %v23_v38 = vld [vmem:[#allocation0 + $0x40] ss:$8 sm:$0xf0]   ;;  %v446_v46 = vsel %vm16_vm0, %v444_v40, %v442_v36  ;;  %s788_s18 = smov 48   ;;  %s789_s4 = smov 32   ;;  %vm178_vm3 = vcmask 917248  }
  0x2a   :  { %v14_v39 = vld [vmem:[#allocation0] ss:$8 sm:$0xf]   ;;  %v25_v41 = vsel %vm16_vm0, %v23_v38, %v21_v37  ;;  %v486_v47 = vld [vmem:[#allocation0 + $0x183] ss:$8 sm:$0xf]  }
  0x2b   :  { %v15_v42 = vld [vmem:[#allocation0] ss:$8 sm:$0xf0]   ;;  %693 = vst.msk [vmem:[%s1165_s1 + $0x8] sm:$0xff] %vm18_vm1, %v25_v41   ;;  %vm265_vm4 = vcmask 786048   ;;  %vm352_vm5 = vcmask 654848  }
  0x2c   :  { %v17_v43 = vsel %vm16_vm0, %v15_v42, %v14_v39  ;;  %v475_v51 = vld [vmem:[#allocation0 + $0x83] ss:$8 sm:$0xf]   ;;  %v30_v53 = vld [vmem:[#allocation0 + $0x80] ss:$8 sm:$0xf]  }
  0x2d   :  { %19 = vst.msk [vmem:[%s1165_s1] sm:$0xff] %vm18_vm1, %v17_v43   ;;  %v477_v52 = vld [vmem:[#allocation0 + $0x83] ss:$8 sm:$0xf0]   ;;  %vm439_vm6 = vcmask 523648   ;;  %vm526_vm7 = vcmask 392448  }
  0x2e   :  { %v32_v54 = vld [vmem:[#allocation0 + $0x80] ss:$8 sm:$0xf0]   ;;  %v479_v0 = vsel %vm16_vm0, %v477_v52, %v475_v51  ;;  %v519_v1 = vld [vmem:[#allocation0 + $0x2] ss:$8 sm:$0xf]  }
  0x2f   :  { %263 = vrot.lane.b32.xlu1 %v262_v48, %s786_s12  ;;  %241 = vrot.lane.b32.xlu2 %v240_v49, %s785_s11  ;;  %v488_v48 = vld [vmem:[#allocation0 + $0x183] ss:$8 sm:$0xf0]   ;;  %v34_v55 = vsel %vm16_vm0, %v32_v54, %v30_v53  ;;  %v57_v56 = vld [vmem:[#allocation0 + $0x140] ss:$8 sm:$0xf]  }
  0x30   :  { %v464_v49 = vld [vmem:[#allocation0 + $0x143] ss:$8 sm:$0xf]   ;;  %694 = vst.msk [vmem:[%s1165_s1 + $0x10] sm:$0xff] %vm18_vm1, %v34_v55   ;;  %v490_v61 = vsel %vm16_vm0, %v488_v48, %v486_v47  ;;  %vm613_vm8 = vcmask 261248  }
  0x31   :  { %252 = vrot.lane.b32.xlu0 %v251_v50, %s785_s11  ;;  %v466_v50 = vld [vmem:[#allocation0 + $0x143] ss:$8 sm:$0xf0]   ;;  %v50_v60 = vld [vmem:[#allocation0 + $0x100] ss:$8 sm:$0xf0]  }
  0x32   :  { %v468_v62 = vsel %vm16_vm0, %v466_v50, %v464_v49  ;;  %v508_v5 = vld [vmem:[#allocation0 + $0x1c3] ss:$8 sm:$0xf]   ;;  %v66_v7 = vld [vmem:[#allocation0 + $0x180] ss:$8 sm:$0xf]  }
  0x33   :  { %v510_v6 = vld [vmem:[#allocation0 + $0x1c3] ss:$8 sm:$0xf0]   ;;  %v68_v8 = vld [vmem:[#allocation0 + $0x180] ss:$8 sm:$0xf0]  }
  0x34   :  { %v70_v10 = vsel %vm16_vm0, %v68_v8, %v66_v7  ;;  %v39_v14 = vld [vmem:[#allocation0 + $0xc0] ss:$8 sm:$0xf]   ;;  %v512_v19 = vsel %vm16_vm0, %v510_v6, %v508_v5  ;;  %v529_v24 = vld [vmem:[#allocation0 + $0x102] ss:$8 sm:$0xf]  }
  0x35   :  { %698 = vst.msk [vmem:[%s1165_s1 + $0x30] sm:$0xff] %vm18_vm1, %v70_v10   ;;  %v41_v15 = vld [vmem:[#allocation0 + $0xc0] ss:$8 sm:$0xf0]  }
  0x36   :  { %v43_v18 = vsel %vm16_vm0, %v41_v15, %v39_v14  ;;  %v531_v25 = vld [vmem:[#allocation0 + $0x102] ss:$8 sm:$0xf0]   ;;  %v616_v42 = vld [vmem:[#allocation0 + $0x101] ss:$8 sm:$0xf]  }
  0x37   :  { %295 = vrot.lane.b32.xlu1 %v294_v57, %s786_s12  ;;  %273 = vrot.lane.b32.xlu2 %v272_v58, %s786_s12  ;;  %v59_v57 = vld [vmem:[#allocation0 + $0x140] ss:$8 sm:$0xf0]   ;;  %695 = vst.msk [vmem:[%s1165_s1 + $0x18] sm:$0xff] %vm18_vm1, %v43_v18   ;;  %v533_v28 = vsel %vm16_vm0, %v531_v25, %v529_v24 }
  0x38   :  { %v61_v58 = vsel %vm16_vm0, %v59_v57, %v57_v56  ;;  %v542_v26 = vld [vmem:[#allocation0 + $0x42] ss:$8 sm:$0xf0]   ;;  %v618_v43 = vld [vmem:[#allocation0 + $0x101] ss:$8 sm:$0xf0]  }
  0x39   :  { %284 = vrot.lane.b32.xlu0 %v283_v59, %s786_s12  ;;  %v48_v59 = vld [vmem:[#allocation0 + $0x100] ss:$8 sm:$0xf]   ;;  %697 = vst.msk [vmem:[%s1165_s1 + $0x28] sm:$0xff] %vm18_vm1, %v61_v58   ;;  %v620_v51 = vsel %vm16_vm0, %v618_v43, %v616_v42 }
  0x3a   :  { %v52_v63 = vsel %vm16_vm0, %v50_v60, %v48_v59  ;;  %v573_v32 = vld [vmem:[#allocation0 + $0x182] ss:$8 sm:$0xf]   ;;  %v608_v50 = vld [vmem:[#allocation0 + $0x1] ss:$8 sm:$0xf0]  }
  0x3b   :  { %696 = vst.msk [vmem:[%s1165_s1 + $0x20] sm:$0xff] %vm18_vm1, %v52_v63   ;;  %v562_v35 = vld [vmem:[#allocation0 + $0x82] ss:$8 sm:$0xf]  }
  0x3c   :  { %v564_v36 = vld [vmem:[#allocation0 + $0x82] ss:$8 sm:$0xf0]   ;;  %v649_v54 = vld [vmem:[#allocation0 + $0x81] ss:$8 sm:$0xf]  }
  0x3d   :  { %v575_v38 = vld [vmem:[#allocation0 + $0x182] ss:$8 sm:$0xf0]   ;;  %v566_v40 = vsel %vm16_vm0, %v564_v36, %v562_v35  ;;  %v651_v55 = vld [vmem:[#allocation0 + $0x81] ss:$8 sm:$0xf0]  }
  0x3e   :  { %v577_v41 = vsel %vm16_vm0, %v575_v38, %v573_v32  ;;  %v595_v47 = vld [vmem:[#allocation0 + $0x1c2] ss:$8 sm:$0xf]   ;;  %v638_v56 = vld [vmem:[#allocation0 + $0x141] ss:$8 sm:$0xf]   ;;  %v653_v63 = vsel %vm16_vm0, %v651_v55, %v649_v54 }
  0x3f   :  { %328 = vrot.lane.b32.xlu1 %v327_v2, %s786_s12  ;;  %306 = vrot.lane.b32.xlu2 %v305_v3, %s786_s12  ;;  %v521_v2 = vld [vmem:[#allocation0 + $0x2] ss:$8 sm:$0xf0]   ;;  %v497_v3 = vld [vmem:[#allocation0 + $0xc3] ss:$8 sm:$0xf]  }
  0x40   :  { %v523_v16 = vsel %vm16_vm0, %v521_v2, %v519_v1  ;;  %v597_v48 = vld [vmem:[#allocation0 + $0x1c2] ss:$8 sm:$0xf0]   ;;  %v627_v59 = vld [vmem:[#allocation0 + $0x41] ss:$8 sm:$0xf]  }
  0x41   :  { %317 = vrot.lane.b32.xlu0 %v316_v4, %s786_s12  ;;  %v499_v4 = vld [vmem:[#allocation0 + $0xc3] ss:$8 sm:$0xf0]   ;;  %v599_v52 = vsel %vm16_vm0, %v597_v48, %v595_v47  ;;  %v629_v60 = vld [vmem:[#allocation0 + $0x41] ss:$8 sm:$0xf0]  }
  0x42   :  { %v501_v17 = vsel %vm16_vm0, %v499_v4, %v497_v3  ;;  %v682_v2 = vld [vmem:[#allocation0 + $0x1c1] ss:$8 sm:$0xf]  }
  0x43   :  { %v684_v3 = vld [vmem:[#allocation0 + $0x1c1] ss:$8 sm:$0xf0]  }
  0x44   :  { %v671_v4 = vld [vmem:[#allocation0 + $0xc1] ss:$8 sm:$0xf]  }
  0x45   :  { %v660_v7 = vld [vmem:[#allocation0 + $0x181] ss:$8 sm:$0xf]  }
  0x46   :  { %v662_v8 = vld [vmem:[#allocation0 + $0x181] ss:$8 sm:$0xf0]  }
  0x47   :  { %360 = vrot.lane.b32.xlu1 %v359_v11, %s787_s13  ;;  %339 = vrot.lane.b32.xlu2 %v338_v12, %s786_s12  ;;  %v75_v11 = vld [vmem:[#allocation0 + $0x1c0] ss:$8 sm:$0xf]   ;;  %v673_v10 = vld [vmem:[#allocation0 + $0xc1] ss:$8 sm:$0xf0]  }
  0x48   :  { %v77_v12 = vld [vmem:[#allocation0 + $0x1c0] ss:$8 sm:$0xf0]  }
  0x49   :  { %350 = vrot.lane.b32.xlu0 %v349_v13, %s787_s13  ;;  %v79_v13 = vsel %vm16_vm0, %v77_v12, %v75_v11  ;;  %v686_v11 = vsel %vm16_vm0, %v684_v3, %v682_v2  ;;  %v664_v12 = vsel %vm16_vm0, %v662_v8, %v660_v7 }
  0x4a   :  { %699 = vst.msk [vmem:[%s1165_s1 + $0x38] sm:$0xff] %vm18_vm1, %v79_v13   ;;  %v675_v13 = vsel %vm16_vm0, %v673_v10, %v671_v4 }
  0x4f   :  { %393 = vrot.lane.b32.xlu1 %v392_v20, %s787_s13  ;;  %371 = vrot.lane.b32.xlu2 %v370_v21, %s787_s13  ;;  %v551_v20 = vld [vmem:[#allocation0 + $0x142] ss:$8 sm:$0xf]  }
  0x50   :  { %v553_v21 = vld [vmem:[#allocation0 + $0x142] ss:$8 sm:$0xf0]  }
  0x51   :  { %382 = vrot.lane.b32.xlu0 %v381_v22, %s787_s13  ;;  %v540_v22 = vld [vmem:[#allocation0 + $0x42] ss:$8 sm:$0xf]   ;;  %v555_v27 = vsel %vm16_vm0, %v553_v21, %v551_v20 }
  0x57   :  { %426 = vrot.lane.b32.xlu1 %v425_v29, %s787_s13  ;;  %404 = vrot.lane.b32.xlu2 %v403_v30, %s787_s13  ;;  %v544_v29 = vsel %vm16_vm0, %v542_v26, %v540_v22  ;;  %v584_v30 = vld [vmem:[#allocation0 + $0xc2] ss:$8 sm:$0xf]  }
  0x59   :  { %415 = vrot.lane.b32.xlu0 %v414_v31, %s787_s13  ;;  %v586_v31 = vld [vmem:[#allocation0 + $0xc2] ss:$8 sm:$0xf0]  }
  0x5a   :  { %v588_v39 = vsel %vm16_vm0, %v586_v31, %v584_v30 }
  0x5f   :  { %458 = vrot.lane.b32.xlu1 %v457_v44, %s788_s18  ;;  %437 = vrot.lane.b32.xlu2 %v436_v45, %s788_s18  ;;  %v606_v44 = vld [vmem:[#allocation0 + $0x1] ss:$8 sm:$0xf]  }
  0x60   :  { %v610_v53 = vsel %vm16_vm0, %v608_v50, %v606_v44 }
  0x61   :  { %447 = vrot.lane.b32.xlu0 %v446_v46, %s788_s18 }
  0x67   :  { %491 = vrot.lane.b32.xlu1 %v490_v61, %s788_s18  ;;  %469 = vrot.lane.b32.xlu2 %v468_v62, %s788_s18  ;;  %v640_v62 = vld [vmem:[#allocation0 + $0x141] ss:$8 sm:$0xf0]  }
  0x68   :  { %v642_v1 = vsel %vm16_vm0, %v640_v62, %v638_v56 }
  0x69   :  { %480 = vrot.lane.b32.xlu0 %v479_v0, %s788_s18  ;;  %v133_v9 = vpop.permute.xlu2 %132   ;;  %v631_v0 = vsel %vm16_vm0, %v629_v60, %v627_v59 }
  0x6a   :  { %703 = vst.msk [vmem:[%s1165_s1 + $0x10] sm:$0xff] %vm91_vm2, %v133_v9  }
  0x6f   :  { %524 = vrot.lane.b32.xlu1 %v523_v16, %s789_s4  ;;  %502 = vrot.lane.b32.xlu2 %v501_v17, %s788_s18 }
  0x71   :  { %513 = vrot.lane.b32.xlu0 %v512_v19, %s788_s18  ;;  %v144_v23 = vpop.permute.xlu2 %143   ;;  %s790_s18 = smov 16  }
  0x72   :  { %704 = vst.msk [vmem:[%s1165_s1 + $0x30] sm:$0xff] %vm91_vm2, %v144_v23  }
  0x77   :  { %556 = vrot.lane.b32.xlu1 %v555_v27, %s789_s4  ;;  %534 = vrot.lane.b32.xlu2 %v533_v28, %s789_s4 }
  0x79   :  { %545 = vrot.lane.b32.xlu0 %v544_v29, %s789_s4  ;;  %v111_v33 = vpop.permute.xlu1 %110   ;;  %v177_v34 = vpop.permute.xlu2 %176  }
  0x7a   :  { %701 = vst.msk [vmem:[%s1165_s1 + $0x8] sm:$0xff] %vm91_vm2, %v111_v33  }
  0x7b   :  { %v90_v37 = vpop.permute.xlu0 %89  }
  0x7c   :  { %92 = vst.msk [vmem:[%s1165_s1] sm:$0xff] %vm91_vm2, %v90_v37  }
  0x7d   :  { %179 = vst.msk [vmem:[%s1165_s1] sm:$0xff] %vm178_vm3, %v177_v34  }
  0x7f   :  { %589 = vrot.lane.b32.xlu1 %v588_v39, %s789_s4  ;;  %567 = vrot.lane.b32.xlu2 %v566_v40, %s789_s4 }
  0x81   :  { %578 = vrot.lane.b32.xlu0 %v577_v41, %s789_s4  ;;  %v122_v45 = vpop.permute.xlu1 %121   ;;  %v209_v46 = vpop.permute.xlu2 %208  }
  0x82   :  { %702 = vst.msk [vmem:[%s1165_s1 + $0x28] sm:$0xff] %vm91_vm2, %v122_v45  }
  0x83   :  { %v100_v49 = vpop.permute.xlu0 %99   ;;  %709 = vst.msk [vmem:[%s1165_s1 + $0x28] sm:$0xff] %vm178_vm3, %v209_v46  }
  0x84   :  { %700 = vst.msk [vmem:[%s1165_s1 + $0x20] sm:$0xff] %vm91_vm2, %v100_v49  }
  0x87   :  { %621 = vrot.lane.b32.xlu1 %v620_v51, %s790_s18  ;;  %600 = vrot.lane.b32.xlu2 %v599_v52, %s789_s4 }
  0x89   :  { %611 = vrot.lane.b32.xlu0 %v610_v53, %s790_s18  ;;  %v166_v57 = vpop.permute.xlu1 %165   ;;  %v242_v58 = vpop.permute.xlu2 %241  }
  0x8a   :  { %706 = vst.msk [vmem:[%s1165_s1 + $0x38] sm:$0xff] %vm91_vm2, %v166_v57  }
  0x8b   :  { %v155_v61 = vpop.permute.xlu0 %154  }
  0x8c   :  { %705 = vst.msk [vmem:[%s1165_s1 + $0x18] sm:$0xff] %vm91_vm2, %v155_v61  }
  0x8d   :  { %712 = vst.msk [vmem:[%s1165_s1 + $0x18] sm:$0xff] %vm178_vm3, %v242_v58  }
  0x8f   :  { %654 = vrot.lane.b32.xlu1 %v653_v63, %s790_s18  ;;  %632 = vrot.lane.b32.xlu2 %v631_v0, %s790_s18 }
  0x91   :  { %643 = vrot.lane.b32.xlu0 %v642_v1, %s790_s18  ;;  %v198_v5 = vpop.permute.xlu1 %197   ;;  %v274_v6 = vpop.permute.xlu2 %273  }
  0x92   :  { %708 = vst.msk [vmem:[%s1165_s1 + $0x8] sm:$0xff] %vm178_vm3, %v198_v5  }
  0x93   :  { %v187_v9 = vpop.permute.xlu0 %186  }
  0x94   :  { %707 = vst.msk [vmem:[%s1165_s1 + $0x20] sm:$0xff] %vm178_vm3, %v187_v9  }
  0x95   :  { %714 = vst.msk [vmem:[%s1165_s1 + $0x20] sm:$0xff] %vm265_vm4, %v274_v6  }
  0x97   :  { %687 = vrot.lane.b32.xlu1 %v686_v11, %s790_s18  ;;  %665 = vrot.lane.b32.xlu2 %v664_v12, %s790_s18 }
  0x99   :  { %676 = vrot.lane.b32.xlu0 %v675_v13, %s790_s18  ;;  %v231_v14 = vpop.permute.xlu1 %230   ;;  %v307_v15 = vpop.permute.xlu2 %306  }
  0x9a   :  { %711 = vst.msk [vmem:[%s1165_s1 + $0x30] sm:$0xff] %vm178_vm3, %v231_v14  }
  0x9b   :  { %v220_v16 = vpop.permute.xlu0 %219  }
  0x9c   :  { %710 = vst.msk [vmem:[%s1165_s1 + $0x10] sm:$0xff] %vm178_vm3, %v220_v16  }
  0x9d   :  { %717 = vst.msk [vmem:[%s1165_s1 + $0x10] sm:$0xff] %vm265_vm4, %v307_v15  }
  0xa1   :  { %v264_v17 = vpop.permute.xlu1 %263   ;;  %v340_v18 = vpop.permute.xlu2 %339  }
  0xa2   :  { %266 = vst.msk [vmem:[%s1165_s1] sm:$0xff] %vm265_vm4, %v264_v17  }
  0xa3   :  { %v253_v19 = vpop.permute.xlu0 %252  }
  0xa4   :  { %713 = vst.msk [vmem:[%s1165_s1 + $0x38] sm:$0xff] %vm178_vm3, %v253_v19  }
  0xa5   :  { %720 = vst.msk [vmem:[%s1165_s1 + $0x38] sm:$0xff] %vm265_vm4, %v340_v18  }
  0xa9   :  { %v296_v20 = vpop.permute.xlu1 %295   ;;  %v372_v21 = vpop.permute.xlu2 %371  }
  0xaa   :  { %716 = vst.msk [vmem:[%s1165_s1 + $0x28] sm:$0xff] %vm265_vm4, %v296_v20  }
  0xab   :  { %v285_v22 = vpop.permute.xlu0 %284  }
  0xac   :  { %715 = vst.msk [vmem:[%s1165_s1 + $0x8] sm:$0xff] %vm265_vm4, %v285_v22  }
  0xad   :  { %722 = vst.msk [vmem:[%s1165_s1 + $0x8] sm:$0xff] %vm352_vm5, %v372_v21  }
  0xb1   :  { %v329_v23 = vpop.permute.xlu1 %328   ;;  %v405_v24 = vpop.permute.xlu2 %404  }
  0xb2   :  { %719 = vst.msk [vmem:[%s1165_s1 + $0x18] sm:$0xff] %vm265_vm4, %v329_v23  }
  0xb3   :  { %v318_v25 = vpop.permute.xlu0 %317  }
  0xb4   :  { %718 = vst.msk [vmem:[%s1165_s1 + $0x30] sm:$0xff] %vm265_vm4, %v318_v25  }
  0xb5   :  { %725 = vst.msk [vmem:[%s1165_s1 + $0x30] sm:$0xff] %vm352_vm5, %v405_v24  }
  0xb9   :  { %v361_v26 = vpop.permute.xlu1 %360   ;;  %v438_v27 = vpop.permute.xlu2 %437  }
  0xba   :  { %721 = vst.msk [vmem:[%s1165_s1 + $0x20] sm:$0xff] %vm352_vm5, %v361_v26  }
  0xbb   :  { %v351_v28 = vpop.permute.xlu0 %350  }
  0xbc   :  { %353 = vst.msk [vmem:[%s1165_s1] sm:$0xff] %vm352_vm5, %v351_v28  }
  0xbd   :  { %440 = vst.msk [vmem:[%s1165_s1] sm:$0xff] %vm439_vm6, %v438_v27  }
  0xc1   :  { %v394_v29 = vpop.permute.xlu1 %393   ;;  %v470_v30 = vpop.permute.xlu2 %469  }
  0xc2   :  { %724 = vst.msk [vmem:[%s1165_s1 + $0x10] sm:$0xff] %vm352_vm5, %v394_v29  }
  0xc3   :  { %v383_v31 = vpop.permute.xlu0 %382  }
  0xc4   :  { %723 = vst.msk [vmem:[%s1165_s1 + $0x28] sm:$0xff] %vm352_vm5, %v383_v31  }
  0xc5   :  { %730 = vst.msk [vmem:[%s1165_s1 + $0x28] sm:$0xff] %vm439_vm6, %v470_v30  }
  0xc9   :  { %v427_v32 = vpop.permute.xlu1 %426   ;;  %v503_v33 = vpop.permute.xlu2 %502  }
  0xca   :  { %727 = vst.msk [vmem:[%s1165_s1 + $0x38] sm:$0xff] %vm352_vm5, %v427_v32  }
  0xcb   :  { %v416_v34 = vpop.permute.xlu0 %415  }
  0xcc   :  { %726 = vst.msk [vmem:[%s1165_s1 + $0x18] sm:$0xff] %vm352_vm5, %v416_v34  }
  0xcd   :  { %733 = vst.msk [vmem:[%s1165_s1 + $0x18] sm:$0xff] %vm439_vm6, %v503_v33  }
  0xd1   :  { %v459_v35 = vpop.permute.xlu1 %458   ;;  %v535_v36 = vpop.permute.xlu2 %534  }
  0xd2   :  { %729 = vst.msk [vmem:[%s1165_s1 + $0x8] sm:$0xff] %vm439_vm6, %v459_v35  }
  0xd3   :  { %v448_v37 = vpop.permute.xlu0 %447  }
  0xd4   :  { %728 = vst.msk [vmem:[%s1165_s1 + $0x20] sm:$0xff] %vm439_vm6, %v448_v37  }
  0xd5   :  { %735 = vst.msk [vmem:[%s1165_s1 + $0x20] sm:$0xff] %vm526_vm7, %v535_v36  }
  0xd9   :  { %v492_v38 = vpop.permute.xlu1 %491   ;;  %v568_v39 = vpop.permute.xlu2 %567  }
  0xda   :  { %732 = vst.msk [vmem:[%s1165_s1 + $0x30] sm:$0xff] %vm439_vm6, %v492_v38  }
  0xdb   :  { %v481_v40 = vpop.permute.xlu0 %480  }
  0xdc   :  { %731 = vst.msk [vmem:[%s1165_s1 + $0x10] sm:$0xff] %vm439_vm6, %v481_v40  }
  0xdd   :  { %738 = vst.msk [vmem:[%s1165_s1 + $0x10] sm:$0xff] %vm526_vm7, %v568_v39  }
  0xe1   :  { %v525_v41 = vpop.permute.xlu1 %524   ;;  %v601_v42 = vpop.permute.xlu2 %600  }
  0xe2   :  { %527 = vst.msk [vmem:[%s1165_s1] sm:$0xff] %vm526_vm7, %v525_v41  }
  0xe3   :  { %v514_v43 = vpop.permute.xlu0 %513  }
  0xe4   :  { %734 = vst.msk [vmem:[%s1165_s1 + $0x38] sm:$0xff] %vm439_vm6, %v514_v43  }
  0xe5   :  { %741 = vst.msk [vmem:[%s1165_s1 + $0x38] sm:$0xff] %vm526_vm7, %v601_v42  }
  0xe9   :  { %v557_v44 = vpop.permute.xlu1 %556   ;;  %v633_v45 = vpop.permute.xlu2 %632  }
  0xea   :  { %737 = vst.msk [vmem:[%s1165_s1 + $0x28] sm:$0xff] %vm526_vm7, %v557_v44  }
  0xeb   :  { %v546_v46 = vpop.permute.xlu0 %545  }
  0xec   :  { %736 = vst.msk [vmem:[%s1165_s1 + $0x8] sm:$0xff] %vm526_vm7, %v546_v46  }
  0xed   :  { %743 = vst.msk [vmem:[%s1165_s1 + $0x8] sm:$0xff] %vm613_vm8, %v633_v45  }
  0xf1   :  { %v590_v47 = vpop.permute.xlu1 %589   ;;  %v666_v48 = vpop.permute.xlu2 %665  }
  0xf2   :  { %740 = vst.msk [vmem:[%s1165_s1 + $0x18] sm:$0xff] %vm526_vm7, %v590_v47  }
  0xf3   :  { %v579_v49 = vpop.permute.xlu0 %578  }
  0xf4   :  { %739 = vst.msk [vmem:[%s1165_s1 + $0x30] sm:$0xff] %vm526_vm7, %v579_v49  }
  0xf5   :  { %746 = vst.msk [vmem:[%s1165_s1 + $0x30] sm:$0xff] %vm613_vm8, %v666_v48  }
  0xf9   :  { %v622_v50 = vpop.permute.xlu1 %621  }
  0xfa   :  { %742 = vst.msk [vmem:[%s1165_s1 + $0x20] sm:$0xff] %vm613_vm8, %v622_v50  }
  0xfb   :  { %v612_v51 = vpop.permute.xlu0 %611  }
  0xfc   :  { %614 = vst.msk [vmem:[%s1165_s1] sm:$0xff] %vm613_vm8, %v612_v51  }
 0x101   :  { %v655_v52 = vpop.permute.xlu1 %654  }
 0x102   :  { %745 = vst.msk [vmem:[%s1165_s1 + $0x10] sm:$0xff] %vm613_vm8, %v655_v52  }
 0x103   :  { %v644_v53 = vpop.permute.xlu0 %643  }
 0x104   :  { %744 = vst.msk [vmem:[%s1165_s1 + $0x28] sm:$0xff] %vm613_vm8, %v644_v53  }
 0x109   :  { %v688_v54 = vpop.permute.xlu1 %687  }
 0x10a   :  { %748 = vst.msk [vmem:[%s1165_s1 + $0x38] sm:$0xff] %vm613_vm8, %v688_v54  }
 0x10b   :  { %v677_v55 = vpop.permute.xlu0 %676  }
 0x10c   :  { %747 = vst.msk [vmem:[%s1165_s1 + $0x18] sm:$0xff] %vm613_vm8, %v677_v55  }
 0x10d   :  { %692 = vsyncpa [#allocation1], 1 }

// kernel: dice_loss.1
= control target key start
LH: loop header
LB: loop body
LE: loop exit
PB: predicated region body
PF: predicated region fallthrough
CT: control target
= control target key end

     0   :  { %s434_s9 = smov 0   ;;  %s436_s10 = smov 0   ;;  %s479_s0 = inlined_call_operand.vmem [shape: f32[2,32,128], index: 0, kind: input, shape index: {}]   ;;  %s480_s1 = inlined_call_operand.vmem [shape: f32[2,32,128], index: 1, kind: input, shape index: {}]   ;;  %s481_s2 = inlined_call_operand.vmem [shape: f32[2,3,128], index: 2, kind: output, shape index: {}]  }
   0x1   :  { %s438_s11 = smov 0  }
   0x2 LB: > { %s24_s12 = sadd.s32 1, %s412_s10  ;;  %p359_p0 = scmp.ge.s32.totalorder %s416_s11, 1  ;;  %s416_s11 = sphi %s438_s11, %s12_s11   ;;  %s412_s10 = sphi %s436_s10, %s483_s10   ;;  %s408_s9 = sphi %s434_s9, %s482_s9  }
   0x3   : > { %p26_p1 = scmp.ge.s32.totalorder %s24_s12, 2  ;;  %p148_p2 = scmp.lt.s32.totalorder %s416_s11, 3 }
   0x5   : > { %s485_s12 = smov (%p26_p1, %s24_s12), 0  ;;  %p149_p3 = pnand %p359_p0, %p148_p2 }
   0x6   : > { %p183_p4 = scmp.lt.s32.totalorder (!%p149_p3), %s408_s9, 1 }
   0x7   : > { %152 = sbr.rel (%p149_p3) target bundleno = 41 (0x29), region = 28 }
   0xc   : > { %s487_s9 = smov (!%p183_p4, %s408_s9), 1  ;;  %v418_v3 = vmov 0.0  }
   0xd   : > { %s367_s13 = sshll.u32 %s487_s9, 5  ;;  %s364_s14 = sshll.u32 %s487_s9, 2 }
   0xe   : > { %s190_s17 = scalar_lea.vmem %s479_s0, %s367_s13  ;;  %s200_s20 = scalar_lea.vmem %s480_s1, %s367_s13 }
   0xf   : > { %s461_s23 = scalar_lea.vmem %s481_s2, %s364_s14  ;;  %v211_v0 = vld [vmem:[%s190_s17] sm:$0xff]  ;;  %v212_v1 = vld [vmem:[%s190_s17 + $0x8] sm:$0xff]  ;;  %v213_v2 = vld [vmem:[%s190_s17 + $0x10] sm:$0xff] }
  0x10   : > { %210 = vst [vmem:[%s461_s23] sm:$0x7] %v418_v3  ;;  %v214_v4 = vld [vmem:[%s190_s17 + $0x18] sm:$0xff]  ;;  %v215_v5 = vld [vmem:[%s200_s20] sm:$0xff]  ;;  %v216_v6 = vld [vmem:[%s200_s20 + $0x8] sm:$0xff]  ;;  %v233_v7 = vmul.f32 %v211_v0, %v211_v0  ;;  %v234_v8 = vmul.f32 %v212_v1, %v212_v1  ;;  %v235_v9 = vmul.f32 %v213_v2, %v213_v2 }
  0x11   : > { %v217_v10 = vld [vmem:[%s200_s20 + $0x10] sm:$0xff]  ;;  %v218_v11 = vld [vmem:[%s200_s20 + $0x18] sm:$0xff]  ;;  %v219_v12 = vmul.f32 %v215_v5, %v211_v0  ;;  %v220_v13 = vmul.f32 %v216_v6, %v212_v1  ;;  %v247_v14 = vmul.f32 %v215_v5, %v215_v5  ;;  %v236_v16 = vmul.f32 %v214_v4, %v214_v4 }
  0x12   : > { %v221_v15 = vmul.f32 %v217_v10, %v213_v2  ;;  %v237_v17 = vadd.f32 %v234_v8, %v233_v7  ;;  %v248_v18 = vmul.f32 %v216_v6, %v216_v6  ;;  %v222_v19 = vmul.f32 %v218_v11, %v214_v4 }
  0x13   : > { %v223_v20 = vadd.f32 %v220_v13, %v219_v12  ;;  %v249_v21 = vmul.f32 %v217_v10, %v217_v10  ;;  %v250_v23 = vmul.f32 %v218_v11, %v218_v11 }
  0x14   : > { %v238_v22 = vadd.f32 %v237_v17, %v235_v9  ;;  %v251_v24 = vadd.f32 %v248_v18, %v247_v14 }
  0x15   : > { %v224_v25 = vadd.f32 %v223_v20, %v221_v15 }
  0x16   : > { %v239_v26 = vadd.f32 %v238_v22, %v236_v16  ;;  %v252_v27 = vadd.f32 %v251_v24, %v249_v21 }
  0x17   : > { %v225_v28 = vadd.f32 %v224_v25, %v222_v19  ;;  %v264_v44 = vld [vmem:[%s461_s23 + $0x1] sm:$0x1]  ;;  %v261_v45 = vld [vmem:[%s461_s23] sm:$0x1]  ;;  %v267_v49 = vld [vmem:[%s461_s23 + $0x2] sm:$0x1] }
  0x18   : > { %v240_v29 = vrot.slane %v239_v26, 4  ;;  %v253_v30 = vadd.f32 %v252_v27, %v250_v23 }
  0x19   : > { %v226_v31 = vrot.slane %v225_v28, 4 }
  0x1a   : > { %v241_v32 = vadd.f32 %v240_v29, %v239_v26  ;;  %v254_v33 = vrot.slane %v253_v30, 4 }
  0x1b   : > { %v227_v34 = vadd.f32 %v226_v31, %v225_v28 }
  0x1c   : > { %v242_v35 = vrot.slane %v241_v32, 2  ;;  %v255_v36 = vadd.f32 %v254_v33, %v253_v30 }
  0x1d   : > { %v228_v37 = vrot.slane %v227_v34, 2 }
  0x1e   : > { %v243_v38 = vadd.f32 %v242_v35, %v241_v32  ;;  %v256_v39 = vrot.slane %v255_v36, 2 }
  0x1f   : > { %v229_v40 = vadd.f32 %v228_v37, %v227_v34 }
  0x20   : > { %v244_v41 = vrot.slane %v243_v38, 1  ;;  %v257_v42 = vadd.f32 %v256_v39, %v255_v36 }
  0x21   : > { %v230_v43 = vrot.slane %v229_v40, 1 }
  0x22   : > { %v245_v46 = vadd.f32 %v244_v41, %v243_v38  ;;  %v258_v47 = vrot.slane %v257_v42, 1 }
  0x23   : > { %v231_v48 = vadd.f32 %v230_v43, %v229_v40 }
  0x24   : > { %v265_v50 = vadd.f32 %v264_v44, %v245_v46  ;;  %v259_v51 = vadd.f32 %v258_v47, %v257_v42 }
  0x25   : > { %v262_v52 = vadd.f32 %v261_v45, %v231_v48 }
  0x26   : > { %266 = vst [vmem:[%s461_s23 + $0x1] sm:$0x1] %v265_v50  ;;  %v268_v53 = vadd.f32 %v267_v49, %v259_v51 }
  0x27   : > { %263 = vst [vmem:[%s461_s23] sm:$0x1] %v262_v52 }
  0x28   : > { %269 = vst [vmem:[%s461_s23 + $0x2] sm:$0x1] %v268_v53 }
  0x29 PF: > { %s12_s11 = sadd.s32 1, %s416_s11   ;;  %s482_s9 = smov %s412_s10 }
  0x2a   : > { %p9_p5 = scmp.ge.s32.totalorder %s12_s11, 4   ;;  %s483_s10 = smov %s485_s12 }
  0x2c   :  { %11 = sbr.rel (!%p9_p5) target bundleno = 2 (0x2), region = 65 }

</bundles_post_ra>
